<compile_context>
chip_gen: v7x
topology: tpu7x:2x2x1
jax: 0.10.0
libtpu: 0.0.40
codegen_flags: <defaults>
</compile_context>

<pallas_src>
import jax
import jax.numpy as jnp
from jax import lax
from jax.experimental import pallas as pl
from jax.experimental.pallas import tpu as pltpu


def _disc_kernel(bias_ref, v_ref, hpl_ref, hmi_ref, out_ref):
    # bias_ref : SMEM (1, 1) f32   -- bilinear bias (scalar)
    # v_ref    : (1, n_h)          -- precomputed W @ c (native dtype)
    # hpl_ref  : (TN, n_h)         -- tile of positive embeddings (native dtype)
    # hmi_ref  : (TN, n_h)         -- tile of negative embeddings (native dtype)
    # out_ref  : (2, TN) out_dtype -- row 0 = sc_1 tile, row 1 = sc_2 tile
    b = bias_ref[0, 0]
    v = v_ref[...]                                   # (1, n_h)
    dn = (((1,), (1,)), ((), ()))                    # contract last dims (A @ B^T)
    sc1 = lax.dot_general(v, hpl_ref[...], dn,
                          preferred_element_type=jnp.float32)   # (1, TN) lane-dense
    sc2 = lax.dot_general(v, hmi_ref[...], dn,
                          preferred_element_type=jnp.float32)   # (1, TN) lane-dense
    out_ref[0:1, :] = (sc1 + b).astype(out_ref.dtype)
    out_ref[1:2, :] = (sc2 + b).astype(out_ref.dtype)


def _round_up(x, m):
    return ((x + m - 1) // m) * m


def discriminator_forward(c, h_pl, h_mi, weight, bias,
                          s_bias1=None, s_bias2=None, *,
                          min_pallas_bytes=2 * 1024 * 1024):
    """c: (n_h,), h_pl/h_mi: (N, n_h), weight: (n_h, n_h), bias: scalar.

    Returns logits of shape (2N,) == concat([sc_1, sc_2], -1).
    """
    N, n_h = h_pl.shape
    out_dtype = h_pl.dtype
    itemsize = jnp.dtype(h_pl.dtype).itemsize
    out_itemsize = jnp.dtype(out_dtype).itemsize

    # Reformulated bilinear (out_features == 1):  score = h . (W @ c) + b.
    v_f32 = jnp.dot(weight.astype(jnp.float32), c.astype(jnp.float32))   # (n_h,)
    bias_f32 = jnp.asarray(bias, jnp.float32)

    total_input_bytes = 2 * N * n_h * itemsize
    if total_input_bytes < min_pallas_bytes:
        # Small-problem fast path: pallas_call launch / pipeline warm-up would
        # dominate below a few MB of input.
        sc_1 = jnp.dot(h_pl.astype(jnp.float32), v_f32) + bias_f32
        sc_2 = jnp.dot(h_mi.astype(jnp.float32), v_f32) + bias_f32
        if s_bias1 is not None:
            sc_1 = sc_1 + s_bias1
        if s_bias2 is not None:
            sc_2 = sc_2 + s_bias2
        return jnp.concatenate([sc_1, sc_2], axis=-1).astype(out_dtype)

    # ---- TN sizing: HBM-payload driven, lane-padding & VMEM aware ----------
    # Target ~4 MB of actual HBM payload per input block per grid step.
    target_payload = 4 * 1024 * 1024
    TN = _round_up(max(target_payload // max(n_h * itemsize, 1), 128), 128)
    TN = min(TN, 8192)
    # VMEM footprint uses 128 lanes per row when n_h < 128 (lane padding).
    lane_row_bytes = max(n_h, 128) * itemsize
    vmem_input_budget = 24 * 1024 * 1024            # 2 inputs x 2 buffers budget
    tn_vmem_cap = max((vmem_input_budget // (4 * lane_row_bytes)) // 128 * 128, 128)
    TN = min(TN, tn_vmem_cap)
    # Keep >= 2 grid steps where possible so the "parallel" axis can be split
    # across v7x's two TensorCores; never exceed the (padded) problem size.
    TN = min(TN, max(128, _round_up(pl.cdiv(N, 2), 128)))
    TN = min(TN, _round_up(N, 128))
    grid = (pl.cdiv(N, TN),)

    # Raise the scoped-VMEM limit explicitly (v5e default is only 16 MiB).
    vmem_est = (2 * 2 * TN * lane_row_bytes          # h_pl + h_mi, double-buffered
                + 2 * 2 * TN * out_itemsize          # output rows, double-buffered
                + 2 * lane_row_bytes                 # v
                + (1 << 16))
    vmem_limit = int(min(max(vmem_est * 3 // 2, 32 * 1024 * 1024),
                         48 * 1024 * 1024))

    # Keep the MXU operands in the native streaming dtype (no f32 upcast of
    # the big h streams); accumulation is f32 via preferred_element_type.
    v_in = v_f32.astype(h_pl.dtype).reshape(1, n_h)
    bias_smem = bias_f32.reshape(1, 1)

    out = pl.pallas_call(
        _disc_kernel,
        out_shape=jax.ShapeDtypeStruct((2, N), out_dtype),
        grid=grid,
        in_specs=[
            pl.BlockSpec(memory_space=pltpu.MemorySpace.SMEM),  # bias scalar
            pl.BlockSpec((1, n_h), lambda i: (0, 0)),           # v (resident)
            pl.BlockSpec((TN, n_h), lambda i: (i, 0)),          # h_pl tile
            pl.BlockSpec((TN, n_h), lambda i: (i, 0)),          # h_mi tile
        ],
        out_specs=pl.BlockSpec((2, TN), lambda i: (0, i)),
        compiler_params=pltpu.CompilerParams(
            dimension_semantics=("parallel",),
            vmem_limit_bytes=vmem_limit),
    )(bias_smem, v_in, h_pl, h_mi)

    if s_bias1 is None and s_bias2 is None:
        # (2, N) -> (2N,) is a free row-major reshape == cat((sc_1, sc_2), -1)
        return out.reshape(-1)

    sc_1 = out[0]
    sc_2 = out[1]
    if s_bias1 is not None:
        sc_1 = sc_1 + s_bias1
    if s_bias2 is not None:
        sc_2 = sc_2 + s_bias2
    return jnp.concatenate([sc_1, sc_2], axis=-1).astype(out_dtype)


def init_params(key, n_h):
    # nn.Bilinear(n_h, n_h, 1): weight (1, n_h, n_h) xavier_uniform_, bias 0.
    # fan_in = n_h * n_h, fan_out = 1 * n_h (PyTorch fan calc on (1, n_h, n_h)).
    bound = (6.0 / (n_h * n_h + n_h)) ** 0.5
    w = jax.random.uniform(key, (1, n_h, n_h), jnp.float32, -bound, bound)
    weight = w[0]                      # squeeze out_features == 1
    bias = jnp.float32(0.0)
    return weight, bias


if __name__ == "__main__":
    n_h = 32    # hidden size
    N = 300     # number of nodes (non-multiple of 128 -> exercises the
                # partial last block / masked writeback path)

    key = jax.random.PRNGKey(0)
    kw, kc, kp, km = jax.random.split(key, 4)

    weight, bias = init_params(kw, n_h)
    c = jax.random.normal(kc, (n_h,), jnp.float32)
    h_pl = jax.random.normal(kp, (N, n_h), jnp.float32)
    h_mi = jax.random.normal(km, (N, n_h), jnp.float32)

    # Pure-JAX reference.
    ref_sc1 = (h_pl @ weight) @ c + bias
    ref_sc2 = (h_mi @ weight) @ c + bias
    ref = jnp.concatenate([ref_sc1, ref_sc2], axis=-1)

    # 1) Force the Pallas path at this small demo size.
    logits = discriminator_forward(c, h_pl, h_mi, weight, bias,
                                   min_pallas_bytes=0)
    logits = jax.block_until_ready(logits)
    assert logits.shape == (2 * N,)
    assert jnp.allclose(logits, ref, atol=1e-4, rtol=1e-4)

    # 2) Default byte-based threshold (small problem -> plain-XLA fast path).
    logits_fast = jax.block_until_ready(
        discriminator_forward(c, h_pl, h_mi, weight, bias))
    assert jnp.allclose(logits_fast, ref, atol=1e-4, rtol=1e-4)

    print("KERNEL_OK")
</pallas_src>

<mosaic_0001>
module attributes {stable_mosaic.version = 11 : i64} {
  func.func @_disc_kernel(%arg0: i32, %arg1: memref<1x1xf32, #tpu.memory_space<smem>>, %arg2: memref<1x32xf32, #tpu.memory_space<vmem>>, %arg3: memref<256x32xf32, #tpu.memory_space<vmem>>, %arg4: memref<256x32xf32, #tpu.memory_space<vmem>>, %arg5: memref<2x256xf32, #tpu.memory_space<vmem>>) attributes {dimension_semantics = [#tpu.dimension_semantics<parallel>], iteration_bounds = array<i64: 2>, scalar_prefetch = 0 : i64, scratch_operands = 0 : i64, tpu.core_type = #tpu.core_type<tc>, window_params = [{transform_indices = @transform_0, window_bounds = array<i64: 1, 1>}, {pipeline_mode = #tpu.pipeline_mode<synchronous>, transform_indices = @transform_1, window_bounds = array<i64: 1, 32>}, {transform_indices = @transform_2, window_bounds = array<i64: 256, 32>}, {transform_indices = @transform_3, window_bounds = array<i64: 256, 32>}, {transform_indices = @transform_4, window_bounds = array<i64: 2, 256>}]} {
    %c0 = arith.constant 0 : index
    %c0_0 = arith.constant 0 : index
    %0 = memref.load %arg1[%c0, %c0_0] : memref<1x1xf32, #tpu.memory_space<smem>>
    %c0_1 = arith.constant 0 : index
    %c0_2 = arith.constant 0 : index
    %1 = vector.load %arg2[%c0_1, %c0_2] : memref<1x32xf32, #tpu.memory_space<vmem>>, vector<1x32xf32>
    %c0_3 = arith.constant 0 : index
    %c0_4 = arith.constant 0 : index
    %2 = vector.load %arg3[%c0_3, %c0_4] : memref<256x32xf32, #tpu.memory_space<vmem>>, vector<256x32xf32>
    %cst = arith.constant dense<0.000000e+00> : vector<1x256xf32>
    %3 = tpu.matmul %1, %2, %cst {dimension_numbers = #tpu.dot_dimension_numbers<[1], [1], [0], [0], [0, 0, 1, 0], [], []>} : vector<1x32xf32>, vector<256x32xf32>, vector<1x256xf32> -> vector<1x256xf32>
    %c0_5 = arith.constant 0 : index
    %c0_6 = arith.constant 0 : index
    %4 = vector.load %arg4[%c0_5, %c0_6] : memref<256x32xf32, #tpu.memory_space<vmem>>, vector<256x32xf32>
    %cst_7 = arith.constant dense<0.000000e+00> : vector<1x256xf32>
    %5 = tpu.matmul %1, %4, %cst_7 {dimension_numbers = #tpu.dot_dimension_numbers<[1], [1], [0], [0], [0, 0, 1, 0], [], []>} : vector<1x32xf32>, vector<256x32xf32>, vector<1x256xf32> -> vector<1x256xf32>
    %6 = vector.broadcast %0 : f32 to vector<1x256xf32>
    %7 = arith.addf %3, %6 : vector<1x256xf32>
    %c0_8 = arith.constant 0 : index
    %c0_9 = arith.constant 0 : index
    %8 = vector.load %arg5[%c0_8, %c0_9] : memref<2x256xf32, #tpu.memory_space<vmem>>, vector<1x256xf32>
    tpu.vector_store %arg5[%c0_8, %c0_9], %7 {strides = array<i32>} : memref<2x256xf32, #tpu.memory_space<vmem>>, vector<1x256xf32>,
    %9 = vector.broadcast %0 : f32 to vector<1x256xf32>
    %10 = arith.addf %5, %9 : vector<1x256xf32>
    %c1 = arith.constant 1 : index
    %c0_10 = arith.constant 0 : index
    %11 = vector.load %arg5[%c1, %c0_10] : memref<2x256xf32, #tpu.memory_space<vmem>>, vector<1x256xf32>
    tpu.vector_store %arg5[%c1, %c0_10], %10 {strides = array<i32>} : memref<2x256xf32, #tpu.memory_space<vmem>>, vector<1x256xf32>,
    return
  }
  func.func @transform_0(%arg0: i32) -> (i32, i32) {
    %c0_i32 = arith.constant 0 : i32
    %c0_i32_0 = arith.constant 0 : i32
    %c0_i32_1 = arith.constant 0 : i32
    return %c0_i32, %c0_i32_0 : i32, i32
  }
  func.func @transform_1(%arg0: i32) -> (i32, i32) {
    %c0_i32 = arith.constant 0 : i32
    %c0_i32_0 = arith.constant 0 : i32
    %c0_i32_1 = arith.constant 0 : i32
    return %c0_i32, %c0_i32_0 : i32, i32
  }
  func.func @transform_2(%arg0: i32) -> (i32, i32) {
    %c0_i32 = arith.constant 0 : i32
    %c0_i32_0 = arith.constant 0 : i32
    return %arg0, %c0_i32 : i32, i32
  }
  func.func @transform_3(%arg0: i32) -> (i32, i32) {
    %c0_i32 = arith.constant 0 : i32
    %c0_i32_0 = arith.constant 0 : i32
    return %arg0, %c0_i32 : i32, i32
  }
  func.func @transform_4(%arg0: i32) -> (i32, i32) {
    %c0_i32 = arith.constant 0 : i32
    %c0_i32_0 = arith.constant 0 : i32
    return %c0_i32, %arg0 : i32, i32
  }
}

</mosaic_0001>

<bundles_post_ra>
// kernel: tpu_custom_call.1
= control target key start
LH: loop header
LB: loop body
LE: loop exit
PB: predicated region body
PF: predicated region fallthrough
CT: control target
= control target key end

     0   :  { %s1450_s0 = inlined_call_operand.<no memory space> [shape: f32[1,1], index: 0, kind: input, shape index: {}]   ;;  %s1451_s1 = inlined_call_operand.vmem [shape: f32[1,32], index: 1, kind: input, shape index: {}]   ;;  %s1452_s2 = inlined_call_operand.vmem [shape: f32[300,32], index: 2, kind: input, shape index: {}]   ;;  %s1453_s3 = inlined_call_operand.vmem [shape: f32[300,32], index: 3, kind: input, shape index: {}]   ;;  %s1454_s4 = inlined_call_operand.hbm [shape: f32[2,300], index: 4, kind: output, shape index: {}]  }
   0x1   :  { %9 = sst [smem:[#allocation2]] %s1450_s0 }
   0x2   :  { %10 = vsyncpa [#allocation4], 0 }
   0x3   :  { %12 = vsyncpa [#allocation4 + $0x1], 0  ;;  %s1189_s17 = smov 0   ;;  %s1191_s18 = smov 0  }
   0x4   :  { %s1193_s19 = smov 0   ;;  %s1195_s20 = smov 0  }
   0x5 LB: > { %s1210_s0 = sadd.s32 4294967295, %s1157_s20   ;;  %s806_s21 = sadd.s32 4294967294, %s1157_s20   ;;  %s1157_s20 = sphi %s1195_s20, %s1462_s20   ;;  %s1153_s19 = sphi %s1193_s19, %s1461_s19   ;;  %s1149_s18 = sphi %s1191_s18, %s1460_s18   ;;  %s1145_s17 = sphi %s1189_s17, %s1459_s17  }
   0x6   : > { %s1214_s22 = sadd.s32 1, %s1157_s20   ;;  %s119_s23 = sadd.s32 1, %s1153_s19 }
   0x7   : > { %s116_s24 = ssub.s32 %s1157_s20, %s1214_s22  ;;  %p129_p0 = scmp.ne.s32.totalorder %s1153_s19, %s1149_s18 }
   0x8   : > { %p117_p1 = scmp.eq.s32.totalorder %s116_s24, 0  ;;  %p130_p2 = scmp.eq.s32.totalorder %s1210_s0, 1 }
   0x9   : > { %p135_p3 = scmp.ne.s32.totalorder %s1149_s18, %s1145_s17  ;;  %p136_p4 = scmp.eq.s32.totalorder %s806_s21, 1 }
   0xa   : > { %s1225_s25 = scalar_select %p117_p1, %s1153_s19, %s119_s23  }
   0xb   : > { %p1227_p5 = por %p130_p2, %p129_p0  ;;  %p1231_p6 = por %p136_p4, %p135_p3 }
   0xc   : > { %p809_p7 = scmp.ge.s32.totalorder %s1157_s20, 1  ;;  %p194_p8 = scmp.lt.s32.totalorder %s1157_s20, 3 }
   0xe   : > { %p195_p9 = pnand %p809_p7, %p194_p8 }
   0xf   : > { %s811_s28 = sshll.u32 (!%p195_p9), %s1210_s0, 5  ;;  %vm333_vm0 = vcmask (!%p195_p9), 261120   ;;  %v1241_v0 = vld [vmem:[%s1451_s1] sm:$0x1] (!%p195_p9)  ;;  %s230_s12 = sand.u32 (!%p195_p9), 1, %s1149_s18  }
  0x10   : > { %198 = sbr.rel (%p195_p9) target bundleno = 344 (0x158), region = 36  ;;  %p238_p10 = scmp.lt.s32.totalorder (!%p195_p9), %s811_s28, 37  ;;  %924 = vmatprep.mubr.msk.f32.mxu0 (!%p195_p9), %vm333_vm0, %v1241_v0  ;;  %958 = vmatprep.mubr.msk.f32.mxu1 (!%p195_p9), %vm333_vm0, %v1241_v0  ;;  %vm1254_vm1 = vmpackc.low (!%p195_p9), %vm333_vm0, %vm333_vm0 }
  0x11   : > { %s266_s13 = sld [smem:[#allocation2]] (!%p195_p9)  ;;  %s810_s14 = sshll.u32 (!%p195_p9), %s230_s12, 2 }
  0x12   : > { %s232_s15 = scalar_lea.vmem (!%p195_p9), [#allocation3], %s810_s14  ;;  %s1396_s16 = scalar_lea.sflag (!%p195_p9), [#allocation4], %s230_s12 }
  0x17   : > { %s1464_s28 = smov (!%p238_p10, %s811_s28), 37  ;;  %s883_s21 = sshll.u32 (%p1227_p5), %s1210_s0, 1 }
  0x18   : > { %s812_s5 = sshll.u32 %s1464_s28, 3  ;;  %s723_s23 = ssub.s32 (%p1227_p5), 3, %s883_s21 }
  0x19   : > { %s1250_s8 = scalar_lea.vmem %s1452_s2, %s812_s5  ;;  %s1261_s11 = scalar_lea.vmem %s1453_s3, %s812_s5 }
  0x1a   : > { %v284_v2 = vld [vmem:[%s1250_s8 + $0x80] sm:$0xff]  ;;  %v285_v3 = vld [vmem:[%s1250_s8 + $0x88] sm:$0xff]  ;;  %v286_v13 = vld [vmem:[%s1250_s8 + $0x90] sm:$0xff]  ;;  %p724_p11 = scmp.lt.s32.totalorder (%p1227_p5), %s723_s23, 2 }
  0x1b   : > { %v316_v4 = vld [vmem:[%s1261_s11 + $0x80] sm:$0xff]  ;;  %v960_v5 = vpack.c.bf16 %v285_v3, %v284_v2  ;;  %v317_v6 = vld [vmem:[%s1261_s11 + $0x88] sm:$0xff]  ;;  %v287_v15 = vld [vmem:[%s1250_s8 + $0x98] sm:$0xff] }
  0x1c   : > { %v268_v7 = vld [vmem:[%s1250_s8] sm:$0xff]  ;;  %v269_v8 = vld [vmem:[%s1250_s8 + $0x8] sm:$0xff]  ;;  %v1008_v9 = vpack.c.bf16 %v317_v6, %v316_v4  ;;  %v318_v16 = vld [vmem:[%s1261_s11 + $0x90] sm:$0xff]  ;;  %v966_v18 = vpack.c.bf16 %v287_v15, %v286_v13 }
  0x1d   : > { %v963_v10 = vpack.c.bf16 %v269_v8, %v268_v7  ;;  %v300_v11 = vld [vmem:[%s1261_s11] sm:$0xff]  ;;  %v301_v12 = vld [vmem:[%s1261_s11 + $0x8] sm:$0xff]  ;;  %962 = vmatprep.subr.msk.bf16.mxu0 %vm1254_vm1, %v960_v5  ;;  %v319_v17 = vld [vmem:[%s1261_s11 + $0x98] sm:$0xff] }
  0x1e   : > { %v1011_v14 = vpack.c.bf16 %v301_v12, %v300_v11  ;;  %1010 = vmatprep.subr.msk.bf16.mxu1 %vm1254_vm1, %v1008_v9  ;;  %v1014_v19 = vpack.c.bf16 %v319_v17, %v318_v16  ;;  %v270_v20 = vld [vmem:[%s1250_s8 + $0x10] sm:$0xff]  ;;  %v271_v21 = vld [vmem:[%s1250_s8 + $0x18] sm:$0xff]  ;;  %v288_v24 = vld [vmem:[%s1250_s8 + $0xa0] sm:$0xff] }
  0x1f   : > { %965 = vmatpush3.bf16.xpose.msk.msra.mxu0 %vm1254_vm1, %v963_v10  ;;  %v302_v22 = vld [vmem:[%s1261_s11 + $0x10] sm:$0xff]  ;;  %v303_v23 = vld [vmem:[%s1261_s11 + $0x18] sm:$0xff]  ;;  %v289_v25 = vld [vmem:[%s1250_s8 + $0xa8] sm:$0xff]  ;;  %v969_v28 = vpack.c.bf16 %v271_v21, %v270_v20 }
  0x20   : > { %1013 = vmatpush3.bf16.xpose.msk.msra.mxu1 %vm1254_vm1, %v1011_v14  ;;  %968 = vmatprep.subr.msk.bf16.mxu0 %vm1254_vm1, %v966_v18  ;;  %v320_v26 = vld [vmem:[%s1261_s11 + $0xa0] sm:$0xff]  ;;  %v321_v27 = vld [vmem:[%s1261_s11 + $0xa8] sm:$0xff]  ;;  %v1017_v29 = vpack.c.bf16 %v303_v23, %v302_v22  ;;  %v972_v30 = vpack.c.bf16 %v289_v25, %v288_v24  ;;  %v290_v36 = vld [vmem:[%s1250_s8 + $0xb0] sm:$0xff] }
  0x21   : > { %1016 = vmatprep.subr.msk.bf16.mxu1 %vm1254_vm1, %v1014_v19  ;;  %v1020_v31 = vpack.c.bf16 %v321_v27, %v320_v26  ;;  %v272_v32 = vld [vmem:[%s1250_s8 + $0x20] sm:$0xff]  ;;  %v273_v33 = vld [vmem:[%s1250_s8 + $0x28] sm:$0xff]  ;;  %v291_v37 = vld [vmem:[%s1250_s8 + $0xb8] sm:$0xff] }
  0x22   : > { %v304_v34 = vld [vmem:[%s1261_s11 + $0x20] sm:$0xff]  ;;  %v305_v35 = vld [vmem:[%s1261_s11 + $0x28] sm:$0xff]  ;;  %v322_v38 = vld [vmem:[%s1261_s11 + $0xb0] sm:$0xff]  ;;  %v975_v40 = vpack.c.bf16 %v273_v33, %v272_v32  ;;  %v978_v42 = vpack.c.bf16 %v291_v37, %v290_v36  ;;  %v1159_v36 = vmov 1966171168  }
  0x23   : > { %v323_v39 = vld [vmem:[%s1261_s11 + $0xb8] sm:$0xff]  ;;  %v1023_v41 = vpack.c.bf16 %v305_v35, %v304_v34  ;;  %v274_v44 = vld [vmem:[%s1250_s8 + $0x30] sm:$0xff]  ;;  %v292_v48 = vld [vmem:[%s1250_s8 + $0xc0] sm:$0xff]  ;;  %v508_v37 = vunpack.c.l.s4 %v1159_v36 }
  0x24   : > { %v1026_v43 = vpack.c.bf16 %v323_v39, %v322_v38  ;;  %v275_v45 = vld [vmem:[%s1250_s8 + $0x38] sm:$0xff]  ;;  %v306_v46 = vld [vmem:[%s1261_s11 + $0x30] sm:$0xff]  ;;  %v293_v49 = vld [vmem:[%s1250_s8 + $0xc8] sm:$0xff]  ;;  %v510_v38 = vlaneseq  ;;  %v332_v39 = vstv %s266_s13 }
  0x25   : > { %v307_v47 = vld [vmem:[%s1261_s11 + $0x38] sm:$0xff]  ;;  %v324_v50 = vld [vmem:[%s1261_s11 + $0xc0] sm:$0xff]  ;;  %v325_v51 = vld [vmem:[%s1261_s11 + $0xc8] sm:$0xff]  ;;  %v981_v52 = vpack.c.bf16 %v275_v45, %v274_v44  ;;  %v984_v54 = vpack.c.bf16 %v293_v49, %v292_v48 }
  0x26   : > { %v1029_v53 = vpack.c.bf16 %v307_v47, %v306_v46  ;;  %v1032_v55 = vpack.c.bf16 %v325_v51, %v324_v50  ;;  %v276_v56 = vld [vmem:[%s1250_s8 + $0x40] sm:$0xff]  ;;  %v277_v57 = vld [vmem:[%s1250_s8 + $0x48] sm:$0xff]  ;;  %v294_v60 = vld [vmem:[%s1250_s8 + $0xd0] sm:$0xff]  ;;  %vm524_vm2 = vcmp.lt.s32.totalorder %v510_v38, 256 }
  0x27   : > { %971 = vmatpush3.bf16.xpose.msk.msra.mxu0 %vm1254_vm1, %v969_v28  ;;  %v308_v58 = vld [vmem:[%s1261_s11 + $0x40] sm:$0xff]  ;;  %v309_v59 = vld [vmem:[%s1261_s11 + $0x48] sm:$0xff]  ;;  %v295_v61 = vld [vmem:[%s1250_s8 + $0xd8] sm:$0xff]  ;;  %v987_v2 = vpack.c.bf16 %v277_v57, %v276_v56 }
  0x28   : > { %1019 = vmatpush3.bf16.xpose.msk.msra.mxu1 %vm1254_vm1, %v1017_v29  ;;  %974 = vmatprep.subr.msk.bf16.mxu0 %vm1254_vm1, %v972_v30  ;;  %v326_v62 = vld [vmem:[%s1261_s11 + $0xd0] sm:$0xff]  ;;  %v327_v63 = vld [vmem:[%s1261_s11 + $0xd8] sm:$0xff]  ;;  %v1035_v3 = vpack.c.bf16 %v309_v59, %v308_v58  ;;  %v990_v4 = vpack.c.bf16 %v295_v61, %v294_v60  ;;  %v296_v10 = vld [vmem:[%s1250_s8 + $0xe0] sm:$0xff] }
  0x29   : > { %1022 = vmatprep.subr.msk.bf16.mxu1 %vm1254_vm1, %v1020_v31  ;;  %v1038_v5 = vpack.c.bf16 %v327_v63, %v326_v62  ;;  %v278_v6 = vld [vmem:[%s1250_s8 + $0x50] sm:$0xff]  ;;  %v279_v7 = vld [vmem:[%s1250_s8 + $0x58] sm:$0xff]  ;;  %v297_v11 = vld [vmem:[%s1250_s8 + $0xe8] sm:$0xff] }
  0x2a   : > { %v310_v8 = vld [vmem:[%s1261_s11 + $0x50] sm:$0xff]  ;;  %v311_v9 = vld [vmem:[%s1261_s11 + $0x58] sm:$0xff]  ;;  %v328_v12 = vld [vmem:[%s1261_s11 + $0xe0] sm:$0xff]  ;;  %v993_v14 = vpack.c.bf16 %v279_v7, %v278_v6  ;;  %v996_v16 = vpack.c.bf16 %v297_v11, %v296_v10 }
  0x2b   : > { %v329_v13 = vld [vmem:[%s1261_s11 + $0xe8] sm:$0xff]  ;;  %v1041_v15 = vpack.c.bf16 %v311_v9, %v310_v8  ;;  %v280_v18 = vld [vmem:[%s1250_s8 + $0x60] sm:$0xff]  ;;  %v298_v22 = vld [vmem:[%s1250_s8 + $0xf0] sm:$0xff] }
  0x2c   : > { %v1044_v17 = vpack.c.bf16 %v329_v13, %v328_v12  ;;  %v281_v19 = vld [vmem:[%s1250_s8 + $0x68] sm:$0xff]  ;;  %v312_v20 = vld [vmem:[%s1261_s11 + $0x60] sm:$0xff]  ;;  %v299_v23 = vld [vmem:[%s1250_s8 + $0xf8] sm:$0xff] }
  0x2d   : > { %v313_v21 = vld [vmem:[%s1261_s11 + $0x68] sm:$0xff]  ;;  %v330_v24 = vld [vmem:[%s1261_s11 + $0xf0] sm:$0xff]  ;;  %v331_v25 = vld [vmem:[%s1261_s11 + $0xf8] sm:$0xff]  ;;  %v999_v26 = vpack.c.bf16 %v281_v19, %v280_v18  ;;  %v1002_v28 = vpack.c.bf16 %v299_v23, %v298_v22 }
  0x2e   : > { %v1047_v27 = vpack.c.bf16 %v313_v21, %v312_v20  ;;  %v1050_v29 = vpack.c.bf16 %v331_v25, %v330_v24  ;;  %v282_v30 = vld [vmem:[%s1250_s8 + $0x70] sm:$0xff]  ;;  %v283_v31 = vld [vmem:[%s1250_s8 + $0x78] sm:$0xff] }
  0x2f   : > { %977 = vmatpush3.bf16.xpose.msk.msra.mxu0 %vm1254_vm1, %v975_v40  ;;  %v314_v32 = vld [vmem:[%s1261_s11 + $0x70] sm:$0xff]  ;;  %v315_v33 = vld [vmem:[%s1261_s11 + $0x78] sm:$0xff]  ;;  %v1005_v34 = vpack.c.bf16 %v283_v31, %v282_v30  ;;  %v509_v40 = vunpack.c.0.s8 %v508_v37 }
  0x30   : > { %1025 = vmatpush3.bf16.xpose.msk.msra.mxu1 %vm1254_vm1, %v1023_v41  ;;  %980 = vmatprep.subr.msk.bf16.mxu0 %vm1254_vm1, %v978_v42  ;;  %v1053_v35 = vpack.c.bf16 %v315_v33, %v314_v32  ;;  %v511_v41 = vshrl.u32 %v510_v38, 7 }
  0x31   : > { %1028 = vmatprep.subr.msk.bf16.mxu1 %vm1254_vm1, %v1026_v43 }
  0x32   : > { %v512_v47 = vsub.s32 %v509_v40, %v511_v41 }
  0x37   : > { %983 = vmatpush3.bf16.xpose.msk.msra.mxu0 %vm1254_vm1, %v981_v52 }
  0x38   : > { %1031 = vmatpush3.bf16.xpose.msk.msra.mxu1 %vm1254_vm1, %v1029_v53  ;;  %986 = vmatprep.subr.msk.bf16.mxu0 %vm1254_vm1, %v984_v54 }
  0x39   : > { %1034 = vmatprep.subr.msk.bf16.mxu1 %vm1254_vm1, %v1032_v55 }
  0x3f   : > { %989 = vmatpush3.bf16.xpose.msk.msra.mxu0 %vm1254_vm1, %v987_v2 }
  0x40   : > { %1037 = vmatpush3.bf16.xpose.msk.msra.mxu1 %vm1254_vm1, %v1035_v3  ;;  %992 = vmatprep.subr.msk.bf16.mxu0 %vm1254_vm1, %v990_v4 }
  0x41   : > { %1040 = vmatprep.subr.msk.bf16.mxu1 %vm1254_vm1, %v1038_v5 }
  0x47   : > { %995 = vmatpush3.bf16.xpose.msk.msra.mxu0 %vm1254_vm1, %v993_v14 }
  0x48   : > { %1043 = vmatpush3.bf16.xpose.msk.msra.mxu1 %vm1254_vm1, %v1041_v15  ;;  %998 = vmatprep.subr.msk.bf16.mxu0 %vm1254_vm1, %v996_v16 }
  0x49   : > { %1046 = vmatprep.subr.msk.bf16.mxu1 %vm1254_vm1, %v1044_v17 }
  0x4f   : > { %1001 = vmatpush3.bf16.xpose.msk.msra.mxu0 %vm1254_vm1, %v999_v26 }
  0x50   : > { %1049 = vmatpush3.bf16.xpose.msk.msra.mxu1 %vm1254_vm1, %v1047_v27  ;;  %1004 = vmatprep.subr.msk.bf16.mxu0 %vm1254_vm1, %v1002_v28 }
  0x51   : > { %1052 = vmatprep.subr.msk.bf16.mxu1 %vm1254_vm1, %v1050_v29 }
  0x57   : > { %1007 = vmatpush3.bf16.xpose.msk.msra.mxu0 %vm1254_vm1, %v1005_v34 }
  0x58   : > { %1055 = vmatpush3.bf16.xpose.msk.msra.mxu1 %vm1254_vm1, %v1053_v35 }
  0x5e   : > { %925 = vmatmul.mubr.msk.f32.vlgmr.msra.gmra.mrb[0].mxu0 %vm333_vm0, %v1241_v0 }
  0x5f   : > { %959 = vmatmul.mubr.msk.f32.vlgmr.msra.gmra.mrb[0].mxu1 %vm333_vm0, %v1241_v0 }
 0x131   : > { %v499_v42 = vpop.f32.mrb[0].mxu0 }
 0x132   : > { %v500_v43 = vadd.f32 %v499_v42, %v332_v39  ;;  %v689_v44 = vpop.f32.mrb[0].mxu1  ;;  %v501_v45 = vpop.f32.mrb[1].mxu0 }
 0x133   : > { %v690_v1 = vadd.f32 %v689_v44, %v332_v39  ;;  %v502_v46 = vadd.f32 %v501_v45, %v332_v39  ;;  %v691_v48 = vpop.f32.mrb[1].mxu1 }
 0x134   : > { %v692_v49 = vadd.f32 %v691_v48, %v332_v39 }
 0x135   : > { %v506_v50 = vcombine.low %v500_v43, %v502_v46 }
 0x136   : > { %v696_v0 = vcombine.low %v690_v1, %v692_v49  ;;  %721 = sbr.rel (!%p1227_p5) target bundleno = 344 (0x158), region = 40 }
 0x137   : > { %v513_v51 = vrot.slane %v506_v50, %v512_v47 }
 0x138   : > { %v703_v52 = vrot.slane %v696_v0, %v512_v47 }
 0x139   : > { %v520_v53 = vrot.slane %v513_v51, %v512_v47 }
 0x13a   : > { %v710_v54 = vrot.slane %v703_v52, %v512_v47 }
 0x13b   : > { %526 = vst.msk [vmem:[%s232_s15] ss:$2 sm:$0x3] %vm524_vm2, %v520_v53 }
 0x13c   : > { %881 = vst.msk [vmem:[%s232_s15 + $0x1] ss:$2 sm:$0x3] %vm524_vm2, %v710_v54 }
 0x13d   : > { %s1466_s23 = smov (!%p724_p11, %s723_s23), 2 }
 0x13e   : > { %s1401_s24 = sshll.u32 %s1466_s23, 5 }
 0x13f   : > { %s728_s28 = ssub.s32 64, %s1401_s24 }
 0x140   : > { %729 = vsyncadd %s1396_s16, %s728_s28  ;;  %p885_p12 = scmp.ne.s32.totalorder %s1401_s24, 0  ;;  %s891_s29 = sshll.u32 %s1210_s0, 6 }
 0x141   : > { %s1410_s5 = scalar_lea.hbm %s1454_s4, %s891_s29  ;;  %s735_s6 = sshll.u32 %s232_s15, 4  ;;  %s736_s6 = int_to_ptr.vmem [resolvable:$true] %s735_s6 }
 0x142   : > { %s1095_s7 = scalar_lea.vmem %s736_s6, %s1401_s24  ;;  %s1160_s8 = smov [#allocation3]  }
 0x143   : > { %p1096_p13 = scmp.ne.s32.totalorder %s736_s6, %s1095_s7  ;;  %s1099_s9 = sshll.u32 %s1160_s8, 4  ;;  %s1100_s9 = int_to_ptr.vmem [resolvable:$false] %s1099_s9 }
 0x144   : > { %s1101_s10 = scalar_lea.vmem %s1100_s9, 128  ;;  %p1102_p2 = scmp.lt.s32.totalorder %s736_s6, %s1100_s9 }
 0x145   : > { %p1097_p0 = pnand %p1096_p13, %p885_p12  ;;  %p1103_p3 = scmp.lt.s32.totalorder %s1101_s10, %s1095_s7 }
 0x147   : > { %p1098_p1 = pneg %p1097_p0  ;;  %p1104_p4 = por %p1103_p3, %p1102_p2 }
 0x149   : > { %p1105_p5 = pnand %p1104_p4, %p1098_p1 }
 0x14b   : > { %1108 = shalt.err (!%p1105_p5)
}
 0x14c   : > { %s1109_s0 = scalar_lea.hbm %s1410_s5, %s1401_s24  ;;  %s1113_s13 = scalar_lea.hbm %s1454_s4, 96 }
 0x14d   : > { %p1110_p7 = scmp.ne.s32.totalorder %s1410_s5, %s1109_s0  ;;  %p1114_p10 = scmp.lt.u32.totalorder %s1410_s5, %s1454_s4 }
 0x14e   : > { %p1115_p11 = scmp.lt.u32.totalorder %s1113_s13, %s1109_s0  ;;  %p1117_p0 = scmp.lt.u32.totalorder %s1109_s0, %s1410_s5 }
 0x14f   : > { %p1111_p8 = pnand %p1110_p7, %p885_p12 }
 0x150   : > { %p1116_p13 = por %p1115_p11, %p1114_p10 }
 0x151   : > { %p1112_p9 = pneg %p1111_p8 }
 0x152   : > { %p1118_p1 = por %p1117_p0, %p1116_p13 }
 0x154   : > { %p1119_p2 = pnand %p1118_p1, %p1112_p9 }
 0x156   : > { %1122 = shalt.err (!%p1119_p2)
}
 0x157   : > { %738 = dma.vmem_to_hbm [thread:$0]  (%p885_p12), %s736_s6, %s1401_s24, %s1410_s5, %s1396_s16  }
 0x158 PF: > { %p1061_p3 = scmp.ge.s32.totalorder %s1157_s20, 2  ;;  %s747_s21 = sand.u32 1, %s1145_s17  }
 0x159   : > { %s748_s23 = scalar_lea.sflag [#allocation4], %s747_s21 }
 0x15a   : > { %p1058_p4 = pnand %p1061_p3, %p1231_p6 }
 0x15c   : > { %1140 = dma.done.wait (!%p1058_p4), %s748_s23, 64  }
 0x15d   : > { %1142 = vsyncadd (!%p1058_p4), %s748_s23, 4294967232  ;;  %p15_p5 = scmp.ge.s32.totalorder %s1214_s22, 4   ;;  %s1459_s17 = smov %s1149_s18 }
 0x15e   : > { %s1460_s18 = smov %s1153_s19  ;;  %s1461_s19 = smov %s1225_s25 }
 0x15f   : > { %s1462_s20 = smov %s1214_s22  ;;  %17 = sbr.rel (!%p15_p5) target bundleno = 5 (0x5), region = 75 }
 0x166   :  { %753 = vsyncpa [#allocation4], 1 }
 0x167   :  { %755 = vsyncpa [#allocation4 + $0x1], 1 }

</bundles_post_ra>
